<compile_context>
chip_gen: v5e
topology: v5e:2x2
jax: 0.10.0
libtpu: 0.0.40
codegen_flags: <defaults>
</compile_context>

<pallas_src>
import math

import jax
import jax.numpy as jnp
from jax import lax
from jax.experimental import pallas as pl
from jax.experimental.pallas import tpu as pltpu

GELU_C1 = math.sqrt(2.0 / math.pi)
GELU_C2 = GELU_C1 * 0.044715


# ----------------------------- small helpers --------------------------------

def _cdiv(a, b):
    return (a + b - 1) // b


def _round_up(a, b):
    return _cdiv(a, b) * b


def _pad_to(a, shape):
    if a.shape == tuple(shape):
        return a
    return jnp.pad(a, [(0, t - s) for s, t in zip(a.shape, shape)])


def _vmem_budget_bytes():
    """~0.75 * physical VMEM; falls back to a v7x-safe 64 MiB assumption."""
    cap = None
    try:
        info = pltpu.get_tpu_info()
        for attr in ("vmem_capacity_bytes", "vmem_size_bytes", "vmem_bytes"):
            v = getattr(info, attr, None)
            if isinstance(v, int) and v > 0:
                cap = v
                break
    except Exception:
        cap = None
    if cap is None:
        cap = 64 * 1024 * 1024
    return int(cap * 0.75)


def _select_row_tile(M8, tm_target):
    """Row tile: multiple of 8, >=2 tiles when possible (megacore), balanced so
    padded-row waste stays < 8 rows per tile."""
    tm = max(8, min(_round_up(tm_target, 8), M8))
    nr = _cdiv(M8, tm)
    if nr < 2 and M8 >= 16:
        nr = 2
    tm = _round_up(_cdiv(M8, nr), 8)
    nr = _cdiv(M8, tm)
    return tm, nr * tm


def _select_ff_tile(dff_128, cap):
    """Largest multiple of 128 that divides the 128-rounded d_ff and is <= cap
    (no extra padding beyond the 128 rounding)."""
    n = dff_128 // 128
    cap_blocks = max(1, cap // 128)
    best = 1
    for d in range(1, min(n, cap_blocks) + 1):
        if n % d == 0:
            best = d
    return best * 128


def _resident_vmem_bytes(tm, dm_p, dff_p, xbytes, wbytes):
    weights = 2 * 2 * dm_p * dff_p * wbytes          # w1 + w2 (double-buffered)
    io = 2 * 2 * tm * dm_p * xbytes                  # x tile + out tile
    inter = 2 * tm * dff_p * 4                       # f32 h/g intermediates
    return weights + io + inter


def _ktiled_vmem_bytes(tm, dm_p, tk_ff, xbytes, wbytes):
    weights = 2 * 2 * dm_p * tk_ff * wbytes
    io = 2 * 2 * tm * dm_p * xbytes
    acc = tm * dm_p * 4
    inter = 2 * tm * tk_ff * 4
    return weights + io + acc + inter


# ------------------------------- kernels -------------------------------------

def _ffn_compute(x_ref, w1_ref, b1_ref, w2_ref):
    """gelu(x @ w1.T + b1) @ w2.T for the current tiles, f32-accumulated."""
    x = x_ref[...]                          # (tm, dm)
    w1 = w1_ref[...]                        # (tk_ff, dm)  torch layout (d_ff, d_model)
    h = lax.dot_general(x, w1, (((1,), (1,)), ((), ())),
                        preferred_element_type=jnp.float32)
    h = h + b1_ref[...].astype(jnp.float32)

    # GELU (tanh approximation), f32, constants folded.
    h2 = h * h
    g = 0.5 * h * (1.0 + jnp.tanh(h * (GELU_C1 + GELU_C2 * h2)))
    # TODO(synk): dropout omitted (identity in eval mode; training RNG mask not reproduced)

    w2 = w2_ref[...]                        # (dm, tk_ff)  torch layout (d_model, d_ff)
    return lax.dot_general(g.astype(w2.dtype), w2, (((1,), (1,)), ((), ())),
                           preferred_element_type=jnp.float32)


def ffn_kernel_resident(x_ref, w1_ref, b1_ref, w2_ref, b2_ref, o_ref):
    # 1-D grid over row tiles; full weights resident in VMEM (constant index_map).
    y = _ffn_compute(x_ref, w1_ref, b1_ref, w2_ref)
    o_ref[...] = (y + b2_ref[...].astype(jnp.float32)).astype(o_ref.dtype)


def _ffn_ktiled_body(x_ref, w1_ref, b1_ref, w2_ref, b2_ref, o_ref, acc_ref):
    # grid = (row tiles, d_ff tiles); axis 1 is the d_ff reduction.
    k = pl.program_id(1)
    part = _ffn_compute(x_ref, w1_ref, b1_ref, w2_ref)

    @pl.when(k == 0)
    def _():
        acc_ref[...] = part                 # direct write: no zero-init pass

    @pl.when(k > 0)
    def _():
        acc_ref[...] += part

    @pl.when(k == pl.num_programs(1) - 1)
    def _():
        o_ref[...] = (acc_ref[...] + b2_ref[...].astype(jnp.float32)).astype(o_ref.dtype)


def ffn_kernel_ktiled_scratch(x_ref, w1_ref, b1_ref, w2_ref, b2_ref, o_ref, acc_ref):
    _ffn_ktiled_body(x_ref, w1_ref, b1_ref, w2_ref, b2_ref, o_ref, acc_ref)


def ffn_kernel_ktiled_inplace(x_ref, w1_ref, b1_ref, w2_ref, b2_ref, o_ref):
    # f32 output: accumulate directly into the resident output block (no scratch).
    _ffn_ktiled_body(x_ref, w1_ref, b1_ref, w2_ref, b2_ref, o_ref, o_ref)


# -------------------------------- wrapper -------------------------------------

def positionwise_feed_forward(x, w1, b1, w2, b2, *, tm=512, tk_ff_cap=512,
                              vmem_budget_bytes=None, force_ktiled=False):
    """x: [B, S, d_model]; torch-layout params:
       w1: [d_ff, d_model], b1: [d_ff], w2: [d_model, d_ff], b2: [d_model]."""
    B, S, d_model = x.shape
    d_ff = w1.shape[0]
    M = B * S

    # Matching matmul dtypes (avoid silent f32 promotion when callers pass bf16 x).
    if w1.dtype != x.dtype:
        w1 = w1.astype(x.dtype)
        w2 = w2.astype(x.dtype)

    xbytes = jnp.dtype(x.dtype).itemsize
    wbytes = jnp.dtype(w1.dtype).itemsize

    dm_p = _round_up(d_model, 128)
    dff_128 = _round_up(d_ff, 128)
    M8 = _round_up(M, 8)

    tm, Mp = _select_row_tile(M8, tm)
    budget = vmem_budget_bytes if vmem_budget_bytes is not None else _vmem_budget_bytes()

    # Prefer the resident-weight variant (weights DMA'd once per call); shrink tm
    # (down to 128 or the already-small row tile) to make it fit if needed.
    floor_tm = min(128, tm)
    tm_res = tm
    while (tm_res > floor_tm and
           _resident_vmem_bytes(tm_res, dm_p, dff_128, xbytes, wbytes) > budget):
        tm_res = max(floor_tm, _round_up(tm_res // 2, 8))
    use_resident = (not force_ktiled) and (
        _resident_vmem_bytes(tm_res, dm_p, dff_128, xbytes, wbytes) <= budget)

    dff_p = dff_128
    if use_resident:
        tm = tm_res
    else:
        tk_ff = _select_ff_tile(dff_128, tk_ff_cap)
        # Shrink tiles until the k-tiled footprint fits the VMEM budget.
        while (_ktiled_vmem_bytes(tm, dm_p, tk_ff, xbytes, wbytes) > budget
               and (tm > 8 or tk_ff > 128)):
            if tm > 8 and (tm >= tk_ff or tk_ff <= 128):
                tm = max(8, _round_up(tm // 2, 8))
            else:
                tk_ff = _select_ff_tile(dff_128, max(128, tk_ff // 2))

    Mp = _round_up(M8, tm)

    # Zero padding is exact: padded d_ff rows give h=0 -> gelu(0)=0 and the padded
    # w2 columns are zero; padded d_model / row entries are sliced off below.
    x2d = _pad_to(x.reshape(M, d_model), (Mp, dm_p))
    w1_p = _pad_to(w1, (dff_p, dm_p))
    w2_p = _pad_to(w2, (dm_p, dff_p))
    b1_p = _pad_to(b1.reshape(1, d_ff), (1, dff_p))
    b2_p = _pad_to(b2.reshape(1, d_model), (1, dm_p))

    cparams_kw = dict(vmem_limit_bytes=int(budget))

    if use_resident:
        grid = (Mp // tm,)
        out = pl.pallas_call(
            ffn_kernel_resident,
            out_shape=jax.ShapeDtypeStruct((Mp, dm_p), x.dtype),
            grid_spec=pltpu.PrefetchScalarGridSpec(
                num_scalar_prefetch=0,
                grid=grid,
                in_specs=[
                    pl.BlockSpec((tm, dm_p), lambda i: (i, 0)),      # x row tile
                    pl.BlockSpec((dff_p, dm_p), lambda i: (0, 0)),   # w1 (resident)
                    pl.BlockSpec((1, dff_p), lambda i: (0, 0)),      # b1
                    pl.BlockSpec((dm_p, dff_p), lambda i: (0, 0)),   # w2 (resident)
                    pl.BlockSpec((1, dm_p), lambda i: (0, 0)),       # b2
                ],
                out_specs=pl.BlockSpec((tm, dm_p), lambda i: (i, 0)),
            ),
            compiler_params=pltpu.CompilerParams(
                dimension_semantics=("parallel",), **cparams_kw),
        )(x2d, w1_p, b1_p, w2_p, b2_p)
    else:
        nk = dff_p // tk_ff
        grid = (Mp // tm, nk)
        inplace = jnp.dtype(x.dtype) == jnp.dtype(jnp.float32)
        kernel = ffn_kernel_ktiled_inplace if inplace else ffn_kernel_ktiled_scratch
        scratch = [] if inplace else [pltpu.VMEM((tm, dm_p), jnp.float32)]
        out = pl.pallas_call(
            kernel,
            out_shape=jax.ShapeDtypeStruct((Mp, dm_p), x.dtype),
            grid_spec=pltpu.PrefetchScalarGridSpec(
                num_scalar_prefetch=0,
                grid=grid,
                in_specs=[
                    pl.BlockSpec((tm, dm_p), lambda i, k: (i, 0)),     # x row tile
                    pl.BlockSpec((tk_ff, dm_p), lambda i, k: (k, 0)),  # w1 d_ff tile
                    pl.BlockSpec((1, tk_ff), lambda i, k: (0, k)),     # b1 d_ff tile
                    pl.BlockSpec((dm_p, tk_ff), lambda i, k: (0, k)),  # w2 d_ff tile
                    pl.BlockSpec((1, dm_p), lambda i, k: (0, 0)),      # b2
                ],
                out_specs=pl.BlockSpec((tm, dm_p), lambda i, k: (i, 0)),
                scratch_shapes=scratch,
            ),
            compiler_params=pltpu.CompilerParams(
                dimension_semantics=("parallel", "arbitrary"), **cparams_kw),
        )(x2d, w1_p, b1_p, w2_p, b2_p)

    return out[:M, :d_model].reshape(B, S, d_model)


# ------------------------------ test harness ----------------------------------

def _init_linear_params(key, d_in, d_out):
    """Deterministic PyTorch-style nn.Linear init: U(-1/sqrt(d_in), 1/sqrt(d_in))."""
    kw, kb = jax.random.split(key)
    bound = 1.0 / math.sqrt(d_in)
    w = jax.random.uniform(kw, (d_out, d_in), jnp.float32, -bound, bound)
    b = jax.random.uniform(kb, (d_out,), jnp.float32, -bound, bound)
    return w, b


def _reference(x, w1, b1, w2, b2):
    # Eval-mode reference (dropout = identity), f32, highest-precision matmuls.
    x = x.astype(jnp.float32)
    w1 = w1.astype(jnp.float32); w2 = w2.astype(jnp.float32)
    b1 = b1.astype(jnp.float32); b2 = b2.astype(jnp.float32)
    h = jnp.matmul(x, w1.T, precision=lax.Precision.HIGHEST) + b1
    g = 0.5 * h * (1.0 + jnp.tanh(GELU_C1 * (h + 0.044715 * h ** 3)))
    return jnp.matmul(g, w2.T, precision=lax.Precision.HIGHEST) + b2


if __name__ == "__main__":
    key = jax.random.PRNGKey(0)

    # Case 1: small non-128-aligned dims -> padding path + resident-weight variant.
    B, S, d_model, d_ff = 2, 8, 32, 64
    kx, k1, k2, key = jax.random.split(key, 4)
    x = jax.random.normal(kx, (B, S, d_model), jnp.float32)
    w1, b1 = _init_linear_params(k1, d_model, d_ff)   # nn.Linear(d_model, d_ff)
    w2, b2 = _init_linear_params(k2, d_ff, d_model)   # nn.Linear(d_ff, d_model)
    y = jax.block_until_ready(positionwise_feed_forward(x, w1, b1, w2, b2))
    y_ref = _reference(x, w1, b1, w2, b2)
    assert jnp.allclose(y, y_ref, atol=1e-3, rtol=1e-3), "case 1 mismatch vs reference"

    # Case 2: forced k-tiled variant, f32 -> in-place o_ref accumulation (nk=3).
    B, S, d_model, d_ff = 2, 16, 128, 384
    kx, k1, k2, key = jax.random.split(key, 4)
    x = jax.random.normal(kx, (B, S, d_model), jnp.float32)
    w1, b1 = _init_linear_params(k1, d_model, d_ff)
    w2, b2 = _init_linear_params(k2, d_ff, d_model)
    y = jax.block_until_ready(positionwise_feed_forward(
        x, w1, b1, w2, b2, tk_ff_cap=128, force_ktiled=True))
    y_ref = _reference(x, w1, b1, w2, b2)
    assert jnp.allclose(y, y_ref, atol=1e-3, rtol=1e-3), "case 2 mismatch vs reference"

    # Case 3: bf16 inputs, forced k-tiled -> f32 scratch accumulator path (nk=2).
    B, S, d_model, d_ff = 2, 16, 128, 256
    kx, k1, k2, key = jax.random.split(key, 4)
    x = jax.random.normal(kx, (B, S, d_model), jnp.float32)
    w1, b1 = _init_linear_params(k1, d_model, d_ff)
    w2, b2 = _init_linear_params(k2, d_ff, d_model)
    x_bf = x.astype(jnp.bfloat16)
    w1_bf = w1.astype(jnp.bfloat16)
    w2_bf = w2.astype(jnp.bfloat16)
    y = jax.block_until_ready(positionwise_feed_forward(
        x_bf, w1_bf, b1, w2_bf, b2, tk_ff_cap=128, force_ktiled=True))
    y_ref = _reference(x_bf, w1_bf, b1, w2_bf, b2)
    assert jnp.allclose(y.astype(jnp.float32), y_ref, atol=2e-2, rtol=2e-2), \
        "case 3 mismatch vs reference"

    print("KERNEL_OK")
</pallas_src>

<mosaic_0001>
module attributes {stable_mosaic.version = 11 : i64} {
  func.func @ffn_kernel_resident(%arg0: i32, %arg1: memref<8x128xf32, #tpu.memory_space<vmem>>, %arg2: memref<128x128xf32, #tpu.memory_space<vmem>>, %arg3: memref<1x128xf32, #tpu.memory_space<vmem>>, %arg4: memref<128x128xf32, #tpu.memory_space<vmem>>, %arg5: memref<1x128xf32, #tpu.memory_space<vmem>>, %arg6: memref<8x128xf32, #tpu.memory_space<vmem>>) attributes {dimension_semantics = [#tpu.dimension_semantics<parallel>], iteration_bounds = array<i64: 2>, scalar_prefetch = 0 : i64, scratch_operands = 0 : i64, tpu.core_type = #tpu.core_type<tc>, window_params = [{transform_indices = @transform_0, window_bounds = array<i64: 8, 128>}, {pipeline_mode = #tpu.pipeline_mode<synchronous>, transform_indices = @transform_1, window_bounds = array<i64: 128, 128>}, {pipeline_mode = #tpu.pipeline_mode<synchronous>, transform_indices = @transform_2, window_bounds = array<i64: 1, 128>}, {pipeline_mode = #tpu.pipeline_mode<synchronous>, transform_indices = @transform_3, window_bounds = array<i64: 128, 128>}, {pipeline_mode = #tpu.pipeline_mode<synchronous>, transform_indices = @transform_4, window_bounds = array<i64: 1, 128>}, {transform_indices = @transform_5, window_bounds = array<i64: 8, 128>}]} {
    %c0 = arith.constant 0 : index
    %c0_0 = arith.constant 0 : index
    %0 = vector.load %arg1[%c0, %c0_0] : memref<8x128xf32, #tpu.memory_space<vmem>>, vector<8x128xf32>
    %c0_1 = arith.constant 0 : index
    %c0_2 = arith.constant 0 : index
    %1 = vector.load %arg2[%c0_1, %c0_2] : memref<128x128xf32, #tpu.memory_space<vmem>>, vector<128x128xf32>
    %cst = arith.constant dense<0.000000e+00> : vector<8x128xf32>
    %2 = tpu.matmul %0, %1, %cst {dimension_numbers = #tpu.dot_dimension_numbers<[1], [1], [0], [0], [0, 0, 1, 0], [], []>} : vector<8x128xf32>, vector<128x128xf32>, vector<8x128xf32> -> vector<8x128xf32>
    %c0_3 = arith.constant 0 : index
    %c0_4 = arith.constant 0 : index
    %3 = vector.load %arg3[%c0_3, %c0_4] : memref<1x128xf32, #tpu.memory_space<vmem>>, vector<1x128xf32>
    %4 = vector.broadcast %3 : vector<1x128xf32> to vector<8x128xf32>
    %5 = arith.addf %2, %4 : vector<8x128xf32>
    %6 = arith.mulf %5, %5 : vector<8x128xf32>
    %cst_5 = arith.constant 5.000000e-01 : f32
    %7 = vector.broadcast %cst_5 : f32 to vector<8x128xf32>
    %8 = arith.mulf %7, %5 : vector<8x128xf32>
    %cst_6 = arith.constant 0.0356774069 : f32
    %9 = vector.broadcast %cst_6 : f32 to vector<8x128xf32>
    %10 = arith.mulf %9, %6 : vector<8x128xf32>
    %cst_7 = arith.constant 0.797884583 : f32
    %11 = vector.broadcast %cst_7 : f32 to vector<8x128xf32>
    %12 = arith.addf %11, %10 : vector<8x128xf32>
    %13 = arith.mulf %5, %12 : vector<8x128xf32>
    %14 = math.tanh %13 : vector<8x128xf32>
    %cst_8 = arith.constant 1.000000e+00 : f32
    %15 = vector.broadcast %cst_8 : f32 to vector<8x128xf32>
    %16 = arith.addf %15, %14 : vector<8x128xf32>
    %17 = arith.mulf %8, %16 : vector<8x128xf32>
    %c0_9 = arith.constant 0 : index
    %c0_10 = arith.constant 0 : index
    %18 = vector.load %arg4[%c0_9, %c0_10] : memref<128x128xf32, #tpu.memory_space<vmem>>, vector<128x128xf32>
    %cst_11 = arith.constant dense<0.000000e+00> : vector<8x128xf32>
    %19 = tpu.matmul %17, %18, %cst_11 {dimension_numbers = #tpu.dot_dimension_numbers<[1], [1], [0], [0], [0, 0, 1, 0], [], []>} : vector<8x128xf32>, vector<128x128xf32>, vector<8x128xf32> -> vector<8x128xf32>
    %c0_12 = arith.constant 0 : index
    %c0_13 = arith.constant 0 : index
    %20 = vector.load %arg5[%c0_12, %c0_13] : memref<1x128xf32, #tpu.memory_space<vmem>>, vector<1x128xf32>
    %21 = vector.broadcast %20 : vector<1x128xf32> to vector<8x128xf32>
    %22 = arith.addf %19, %21 : vector<8x128xf32>
    %c0_14 = arith.constant 0 : index
    %c0_15 = arith.constant 0 : index
    %23 = vector.load %arg6[%c0_14, %c0_15] : memref<8x128xf32, #tpu.memory_space<vmem>>, vector<8x128xf32>
    tpu.vector_store %arg6[%c0_14, %c0_15], %22 {strides = array<i32>} : memref<8x128xf32, #tpu.memory_space<vmem>>, vector<8x128xf32>,
    return
  }
  func.func @transform_0(%arg0: i32) -> (i32, i32) {
    %c0_i32 = arith.constant 0 : i32
    %c0_i32_0 = arith.constant 0 : i32
    return %arg0, %c0_i32 : i32, i32
  }
  func.func @transform_1(%arg0: i32) -> (i32, i32) {
    %c0_i32 = arith.constant 0 : i32
    %c0_i32_0 = arith.constant 0 : i32
    %c0_i32_1 = arith.constant 0 : i32
    return %c0_i32, %c0_i32_0 : i32, i32
  }
  func.func @transform_2(%arg0: i32) -> (i32, i32) {
    %c0_i32 = arith.constant 0 : i32
    %c0_i32_0 = arith.constant 0 : i32
    %c0_i32_1 = arith.constant 0 : i32
    return %c0_i32, %c0_i32_0 : i32, i32
  }
  func.func @transform_3(%arg0: i32) -> (i32, i32) {
    %c0_i32 = arith.constant 0 : i32
    %c0_i32_0 = arith.constant 0 : i32
    %c0_i32_1 = arith.constant 0 : i32
    return %c0_i32, %c0_i32_0 : i32, i32
  }
  func.func @transform_4(%arg0: i32) -> (i32, i32) {
    %c0_i32 = arith.constant 0 : i32
    %c0_i32_0 = arith.constant 0 : i32
    %c0_i32_1 = arith.constant 0 : i32
    return %c0_i32, %c0_i32_0 : i32, i32
  }
  func.func @transform_5(%arg0: i32) -> (i32, i32) {
    %c0_i32 = arith.constant 0 : i32
    %c0_i32_0 = arith.constant 0 : i32
    return %arg0, %c0_i32 : i32, i32
  }
}

</mosaic_0001>

<bundles_post_ra>
// kernel: tpu_custom_call.1
= control target key start
LH: loop header
LB: loop body
LE: loop exit
PB: predicated region body
PF: predicated region fallthrough
CT: control target
= control target key end

     0   :  { %10 = vsyncpa [#allocation3], 0  ;;  %s913_s0 = inlined_call_operand.hbm [shape: f32[16,128], index: 0, kind: input, shape index: {}]   ;;  %s914_s1 = inlined_call_operand.hbm [shape: f32[128,128], index: 1, kind: input, shape index: {}]   ;;  %s915_s2 = inlined_call_operand.vmem [shape: f32[1,128], index: 2, kind: input, shape index: {}]   ;;  %s916_s3 = inlined_call_operand.hbm [shape: f32[128,128], index: 3, kind: input, shape index: {}]   ;;  %s917_s4 = inlined_call_operand.vmem [shape: f32[1,128], index: 4, kind: input, shape index: {}]   ;;  %s918_s5 = inlined_call_operand.hbm [shape: f32[16,128], index: 5, kind: output, shape index: {}]  }
   0x1   :  { %12 = vsyncpa [#allocation3 + $0x1], 0 }
   0x2   :  { %13 = vsyncpa [#allocation6], 0 }
   0x3   :  { %14 = vsyncpa [#allocation4], 0 }
   0x4   :  { %16 = vsyncpa [#allocation4 + $0x1], 0  ;;  %s755_s18 = smov 0   ;;  %s757_s19 = smov 0  }
   0x5   :  { %s759_s20 = smov 0   ;;  %s761_s21 = smov 0  }
   0x6 LB: > { %s174_s24 = sshll.u32 %s914_s1, 4  ;;  %s779_s25 = sadd.s32 4294967295, %s719_s21   ;;  %s719_s21 = sphi %s761_s21, %s929_s21   ;;  %s715_s20 = sphi %s759_s20, %s928_s20   ;;  %s711_s19 = sphi %s757_s19, %s927_s19   ;;  %s707_s18 = sphi %s755_s18, %s926_s18   ;;  %s175_s24 = int_to_ptr.hbm [resolvable:$true] %s174_s24 }
   0x7   : > { %p471_p0 = scmp.ge.s32.totalorder %s719_s21, 1  ;;  %p43_p1 = scmp.eq.s32.totalorder %s779_s25, 0 }
   0x8   : > { %p163_p2 = scmp.lt.s32.totalorder %s719_s21, 3  ;;  %s721_s27 = smov [#allocation5]  }
   0x9   : > { %s176_s28 = sshll.u32 %s721_s27, 4  ;;  %s191_s6 = sshll.u32 %s916_s3, 4  ;;  %s177_s28 = int_to_ptr.vmem [resolvable:$true] %s176_s28  ;;  %s192_s6 = int_to_ptr.hbm [resolvable:$true] %s191_s6 }
   0xa   : > { %p784_p3 = pnand %p471_p0, %p163_p2  ;;  %s722_s7 = smov [#allocation7]  }
   0xb   : > { %s193_s8 = sshll.u32 %s722_s7, 4  ;;  %s723_s9 = smov 128   ;;  %s194_s8 = int_to_ptr.vmem [resolvable:$true] %s193_s8 }
   0xc   : > { %p498_p4 = pneg %p784_p3  ;;  %s724_s10 = smov 8  }
   0xd   : > { %s470_s11 = sadd.s32 4294967294, %s719_s21   ;;  %s798_s12 = sadd.s32 1, %s719_s21  }
   0xe   : > { %p499_p6 = pnand %p498_p4, %p43_p1  ;;  %s26_s13 = ssub.s32 %s719_s21, %s798_s12 }
   0xf   : > { %s29_s14 = sadd.s32 1, %s715_s20  ;;  %p27_p7 = scmp.eq.s32.totalorder %s26_s13, 0 }
  0x10   : > { %501 = dma.hbm_to_vmem [thread:$0]  (!%p499_p6), %s175_s24, 2048, %s177_s28, [#allocation6], %s723_s9, %s723_s9, %s724_s10  }
  0x11   : > { %504 = dma.hbm_to_vmem [thread:$0]  (!%p499_p6), %s192_s6, 2048, %s194_s8, [#allocation6], %s723_s9, %s723_s9, %s724_s10  }
  0x12   : > { %p36_p8 = scmp.ne.s32.totalorder %s715_s20, %s711_s19  ;;  %p37_p9 = scmp.eq.s32.totalorder %s719_s21, 0 }
  0x13   : > { %p42_p10 = scmp.ne.s32.totalorder %s711_s19, %s707_s18  ;;  %p150_p13 = scmp.eq.s32.totalorder %s779_s25, 1 }
  0x14   : > { %s809_s15 = scalar_select %p27_p7, %s715_s20, %s29_s14  }
  0x15   : > { %p811_p11 = por %p37_p9, %p36_p8  ;;  %p817_p12 = por %p43_p1, %p42_p10 }
  0x16   : > { %p156_p0 = scmp.eq.s32.totalorder %s470_s11, 1  ;;  %p515_p2 = scmp.lt.s32.totalorder %s719_s21, 2 }
  0x17   : > { %s210_s22 = sand.u32 1, %s715_s20   ;;  %p824_p4 = por %p150_p13, %p36_p8 }
  0x18   : > { %p828_p6 = por %p156_p0, %p42_p10  ;;  %s475_s27 = sshll.u32 %s210_s22, 3 }
  0x19   : > { %s476_s28 = sshll.u32 %s719_s21, 3  ;;  %s214_s7 = scalar_lea.vmem [#allocation2], %s475_s27 }
  0x1a   : > { %s218_s6 = scalar_lea.hbm %s913_s0, %s476_s28  ;;  %s222_s8 = sshll.u32 %s214_s7, 4  ;;  %s223_s8 = int_to_ptr.vmem [resolvable:$true] %s222_s8 }
  0x1b   : > { %s220_s9 = sshll.u32 %s218_s6, 4  ;;  %p838_p7 = pnand %p515_p2, %p811_p11  ;;  %s221_s9 = int_to_ptr.hbm [resolvable:$true] %s220_s9 }
  0x1c   : > { %s211_s11 = scalar_lea.sflag [#allocation3], %s210_s22  ;;  %s619_s13 = sshra.s32 %s221_s9, 4  ;;  %s620_s13 = int_to_ptr.hbm [resolvable:$true] %s619_s13 }
  0x1d   : > { %s621_s14 = scalar_lea.hbm %s620_s13, 8  ;;  %p623_p9 = pneg %p838_p7 }
  0x1e   : > { %p622_p8 = scmp.ne.s32.totalorder %s620_s13, %s621_s14  ;;  %s626_s29 = scalar_lea.hbm %s913_s0, 16 }
  0x1f   : > { %p627_p11 = scmp.lt.s32.totalorder %s620_s13, %s913_s0  ;;  %p628_p0 = scmp.lt.s32.totalorder %s626_s29, %s621_s14 }
  0x20   : > { %p624_p10 = pnand %p623_p9, %p622_p8 }
  0x21   : > { %p629_p2 = por %p628_p0, %p627_p11 }
  0x22   : > { %p625_p13 = pneg %p624_p10 }
  0x24   : > { %p630_p5 = pnand %p629_p2, %p625_p13 }
  0x26   : > { %633 = shalt.err (!%p630_p5)
}
  0x27   : > { %508 = dma.hbm_to_vmem [thread:$0]  (!%p838_p7), %s221_s9, 128, %s223_s8, %s211_s11  }
  0x28   : > { %231 = sbr.rel (%p784_p3) target bundleno = 390 (0x186), region = 40  ;;  %s855_s22 = sand.u32 (!%p784_p3), 1, %s711_s19  }
  0x29   : > { %s478_s6 = sshll.u32 (!%p784_p3), %s855_s22, 3  ;;  %s234_s7 = scalar_lea.sflag (!%p784_p3), [#allocation3], %s855_s22 }
  0x2a   : > { %s861_s13 = scalar_lea.vmem (!%p784_p3), [#allocation2], %s478_s6 }
  0x2d   : > { %694 = dma.done.wait (%p817_p12), %s234_s7, 128  }
  0x2e   : > { %696 = vsyncadd (%p817_p12), %s234_s7, 4294967168 }
  0x2f   : > { %698 = dma.done.wait (%p43_p1), [#allocation6], 4096  }
  0x30   : > { %700 = vsyncadd (%p43_p1), [#allocation6], 4294963200  ;;  %v291_v0 = vld [vmem:[#allocation5 + $0x78] sm:$0xff]  ;;  %v290_v1 = vld [vmem:[#allocation5 + $0x70] sm:$0xff]  ;;  %s483_s8 = sshll.u32 %s779_s25, 3  ;;  %s274_s28 = scalar_lea.vmem [#allocation8], %s478_s6 }
  0x31   : > { %296 = vmatpush.xpose.msra.mxu0 %v291_v0  ;;  %v289_v2 = vld [vmem:[#allocation5 + $0x68] sm:$0xff]  ;;  %v288_v3 = vld [vmem:[#allocation5 + $0x60] sm:$0xff]  ;;  %v287_v4 = vld [vmem:[#allocation5 + $0x58] sm:$0xff]  ;;  %s376_s11 = scalar_lea.hbm %s918_s5, %s483_s8  ;;  %s378_s29 = sshll.u32 %s274_s28, 4  ;;  %s379_s29 = int_to_ptr.vmem [resolvable:$true] %s378_s29 }
  0x32   : > { %v286_v5 = vld [vmem:[#allocation5 + $0x50] sm:$0xff]  ;;  %v285_v6 = vld [vmem:[#allocation5 + $0x48] sm:$0xff]  ;;  %v284_v7 = vld [vmem:[#allocation5 + $0x40] sm:$0xff]  ;;  %s380_s30 = sshll.u32 %s376_s11, 4  ;;  %s366_s16 = scalar_lea.sflag [#allocation4], %s855_s22  ;;  %s381_s30 = int_to_ptr.hbm [resolvable:$true] %s380_s30 }
  0x33   : > { %v283_v8 = vld [vmem:[#allocation5 + $0x38] sm:$0xff]  ;;  %v282_v10 = vld [vmem:[#allocation5 + $0x30] sm:$0xff]  ;;  %v281_v12 = vld [vmem:[#allocation5 + $0x28] sm:$0xff]  ;;  %s663_s25 = sshra.s32 %s381_s30, 4  ;;  %s669_s17 = scalar_lea.hbm %s918_s5, 16  ;;  %s664_s25 = int_to_ptr.hbm [resolvable:$true] %s663_s25 }
  0x34   : > { %v339_v9 = vld [vmem:[#allocation7 + $0x78] sm:$0xff]  ;;  %v338_v11 = vld [vmem:[#allocation7 + $0x70] sm:$0xff]  ;;  %v337_v13 = vld [vmem:[#allocation7 + $0x68] sm:$0xff]  ;;  %s665_s7 = scalar_lea.hbm %s664_s25, 8  ;;  %p670_p12 = scmp.lt.s32.totalorder %s664_s25, %s918_s5 }
  0x35   : > { %297 = vmatpush.xpose.msra.mxu0 %v290_v1  ;;  %344 = vmatpush.xpose.msra.mxu1 %v339_v9  ;;  %v280_v14 = vld [vmem:[#allocation5 + $0x20] sm:$0xff]  ;;  %v279_v16 = vld [vmem:[#allocation5 + $0x18] sm:$0xff]  ;;  %v278_v18 = vld [vmem:[#allocation5 + $0x10] sm:$0xff]  ;;  %p666_p1 = scmp.ne.s32.totalorder %s664_s25, %s665_s7  ;;  %p671_p7 = scmp.lt.s32.totalorder %s669_s17, %s665_s7 }
  0x36   : > { %v336_v15 = vld [vmem:[#allocation7 + $0x60] sm:$0xff]  ;;  %v335_v17 = vld [vmem:[#allocation7 + $0x58] sm:$0xff]  ;;  %v334_v19 = vld [vmem:[#allocation7 + $0x50] sm:$0xff] }
  0x37   : > { %v277_v20 = vld [vmem:[#allocation5 + $0x8] sm:$0xff]  ;;  %v276_v22 = vld [vmem:[#allocation5] sm:$0xff]  ;;  %v275_v24 = vld [vmem:[%s861_s13] sm:$0xff]  ;;  %p667_p3 = pnand %p666_p1, %p824_p4  ;;  %p672_p8 = por %p671_p7, %p670_p12 }
  0x38   : > { %v333_v21 = vld [vmem:[#allocation7 + $0x48] sm:$0xff]  ;;  %v332_v23 = vld [vmem:[#allocation7 + $0x40] sm:$0xff]  ;;  %v331_v25 = vld [vmem:[#allocation7 + $0x38] sm:$0xff] }
  0x39   : > { %298 = vmatpush.xpose.msra.mxu0 %v289_v2  ;;  %345 = vmatpush.xpose.msra.mxu1 %v338_v11  ;;  %v330_v26 = vld [vmem:[#allocation7 + $0x30] sm:$0xff]  ;;  %v329_v27 = vld [vmem:[#allocation7 + $0x28] sm:$0xff]  ;;  %v328_v28 = vld [vmem:[#allocation7 + $0x20] sm:$0xff]  ;;  %p668_p5 = pneg %p667_p3 }
  0x3a   : > { %v327_v29 = vld [vmem:[#allocation7 + $0x18] sm:$0xff]  ;;  %v326_v30 = vld [vmem:[#allocation7 + $0x10] sm:$0xff]  ;;  %v325_v31 = vld [vmem:[#allocation7 + $0x8] sm:$0xff] }
  0x3b   : > { %v324_v32 = vld [vmem:[#allocation7] sm:$0xff]  ;;  %v555_v33 = vld [vmem:[%s915_s2] ss:$0 sm:$0xff]  ;;  %p673_p9 = pnand %p672_p8, %p668_p5 }
  0x3c   : > { %v556_v44 = vld [vmem:[%s917_s4] ss:$0 sm:$0xff] }
  0x3d   : > { %299 = vmatpush.xpose.msra.mxu0 %v288_v3  ;;  %346 = vmatpush.xpose.msra.mxu1 %v337_v13 }
  0x41   : > { %300 = vmatpush.xpose.msra.mxu0 %v287_v4  ;;  %347 = vmatpush.xpose.msra.mxu1 %v336_v15 }
  0x45   : > { %301 = vmatpush.xpose.msra.mxu0 %v286_v5  ;;  %348 = vmatpush.xpose.msra.mxu1 %v335_v17 }
  0x49   : > { %302 = vmatpush.xpose.msra.mxu0 %v285_v6  ;;  %349 = vmatpush.xpose.msra.mxu1 %v334_v19 }
  0x4d   : > { %303 = vmatpush.xpose.msra.mxu0 %v284_v7  ;;  %350 = vmatpush.xpose.msra.mxu1 %v333_v21 }
  0x51   : > { %304 = vmatpush.xpose.msra.mxu0 %v283_v8  ;;  %351 = vmatpush.xpose.msra.mxu1 %v332_v23 }
  0x55   : > { %305 = vmatpush.xpose.msra.mxu0 %v282_v10  ;;  %352 = vmatpush.xpose.msra.mxu1 %v331_v25 }
  0x59   : > { %306 = vmatpush.xpose.msra.mxu0 %v281_v12  ;;  %353 = vmatpush.xpose.msra.mxu1 %v330_v26 }
  0x5d   : > { %307 = vmatpush.xpose.msra.mxu0 %v280_v14  ;;  %354 = vmatpush.xpose.msra.mxu1 %v329_v27 }
  0x61   : > { %308 = vmatpush.xpose.msra.mxu0 %v279_v16  ;;  %355 = vmatpush.xpose.msra.mxu1 %v328_v28 }
  0x65   : > { %309 = vmatpush.xpose.msra.mxu0 %v278_v18  ;;  %356 = vmatpush.xpose.msra.mxu1 %v327_v29 }
  0x69   : > { %310 = vmatpush.xpose.msra.mxu0 %v277_v20  ;;  %357 = vmatpush.xpose.msra.mxu1 %v326_v30 }
  0x6d   : > { %311 = vmatpush.xpose.msra.mxu0 %v276_v22  ;;  %358 = vmatpush.xpose.msra.mxu1 %v325_v31 }
  0x70   : > { %312 = vmatmul.f32.vlgmr.msra.gmra.mxu0 %v275_v24 }
  0x71   : > { %359 = vmatpush.xpose.msra.mxu1 %v324_v32 }
  0xed   : > { %v313_v34 = vpop.f32.mrf.mxu0 }
  0xee   : > { %v314_v35 = vadd.f32 %v555_v33, %v313_v34 }
  0xf0   : > { %v316_v36 = vmul.f32 %v314_v35, %v314_v35  ;;  %v317_v41 = vmul.f32 0.5, %v314_v35 }
  0xf2   : > { %v318_v37 = vmul.f32 0.035677407, %v316_v36 }
  0xf4   : > { %v319_v38 = vadd.f32 0.7978846, %v318_v37 }
  0xf6   : > { %v320_v39 = vmul.f32 %v319_v38, %v314_v35 }
  0xf8   : > { %557 = vtanh.f32 %v320_v39 }
  0xfe   : > { %v558_v40 = vpop.eup %557 }
  0xff   : > { %v322_v42 = vadd.f32 1.0, %v558_v40 }
 0x101   : > { %v323_v43 = vmul.f32 %v322_v42, %v317_v41 }
 0x103   : > { %360 = vmatmul.f32.vlgmr.msra.gmra.mxu1 %v323_v43 }
 0x180   : > { %v361_v45 = vpop.f32.mrf.mxu1 }
 0x181   : > { %v362_v46 = vadd.f32 %v556_v44, %v361_v45 }
 0x183   : > { %364 = vst [vmem:[%s274_s28] sm:$0xff] %v362_v46 }
 0x184   : > { %676 = shalt.err (!%p673_p9)
}
 0x185   : > { %496 = dma.vmem_to_hbm [thread:$0]  (%p824_p4), %s379_s29, 128, %s381_s30, %s366_s16  }
 0x186 PF: > { %s392_s22 = sand.u32 1, %s707_s18   ;;  %p925_p10 = scmp.ge.s32.totalorder %s719_s21, 2 }
 0x187   : > { %s393_s9 = scalar_lea.sflag [#allocation4], %s392_s22 }
 0x188   : > { %p510_p13 = pnand %p925_p10, %p828_p6 }
 0x18a   : > { %p511_p11 = pneg %p510_p13 }
 0x18c   : > { %702 = dma.done.wait (%p511_p11), %s393_s9, 128  }
 0x18d   : > { %704 = vsyncadd (%p511_p11), %s393_s9, 4294967168  ;;  %p19_p0 = scmp.ge.s32.totalorder %s798_s12, 4   ;;  %s926_s18 = smov %s711_s19 }
 0x18e   : > { %s927_s19 = smov %s715_s20  ;;  %s928_s20 = smov %s809_s15 }
 0x18f   : > { %s929_s21 = smov %s798_s12  ;;  %21 = sbr.rel (!%p19_p0) target bundleno = 6 (0x6), region = 93 }
 0x194   :  { %399 = vsyncpa [#allocation3], 1 }
 0x195   :  { %401 = vsyncpa [#allocation3 + $0x1], 1 }
 0x196   :  { %402 = vsyncpa [#allocation6], 1 }
 0x197   :  { %403 = vsyncpa [#allocation4], 1 }
 0x198   :  { %405 = vsyncpa [#allocation4 + $0x1], 1 }

</bundles_post_ra>
